<compile_context>
chip_gen: v5e
topology: v5e:2x2
jax: 0.10.0
libtpu: 0.0.40
codegen_flags: <defaults>
</compile_context>

<pallas_src>
import functools

import jax
import jax.numpy as jnp
from jax.experimental import pallas as pl
from jax.experimental.pallas import tpu as pltpu


def _round_up(x, m):
    return (x + m - 1) // m * m


def _vq_kernel(z_ref, ent_ref, en_ref, zq_ref, idx_ref, sse_ref, *, n_valid):
    # z_ref   : (TM, D)       tile of flattened inputs (caller dtype)
    # ent_ref : (D, n_pad)    pre-normalized, pre-transposed codebook (bf16)
    # en_ref  : (n_pad, D)    pre-normalized codebook (f32) for the gather
    z = z_ref[...].astype(jnp.float32)

    # F.normalize(z, dim=-1) == z / max(||z||, 1e-12)  -> rsqrt * mul (EUP)
    sumsq = jnp.sum(z * z, axis=-1, keepdims=True)
    zn = z * jax.lax.rsqrt(jnp.maximum(sumsq, 1e-24))

    # Cosine scores on the MXU, bf16 operands, f32 accumulation: (TM, n_pad).
    scores = jnp.dot(zn.astype(jnp.bfloat16), ent_ref[...],
                     preferred_element_type=jnp.float32)

    col = jax.lax.broadcasted_iota(jnp.int32, scores.shape, 1)
    if n_valid != scores.shape[-1]:
        # Mask the zero-padded codebook columns (they must never win argmax).
        scores = jnp.where(col < n_valid, scores, -jnp.inf)

    # Unit-norm vectors: argmin ||zq - zn||^2 == argmax cosine score.
    idx = jnp.argmax(scores, axis=-1)                       # (TM,)

    # Gather z_q = onehot @ en (MXU-friendly gather; exact f32 codebook rows).
    onehot = (col == idx[:, None]).astype(jnp.float32)
    zq = jnp.dot(onehot, en_ref[...], preferred_element_type=jnp.float32)
    zq_ref[...] = zq.astype(zq_ref.dtype)

    # Exact per-row squared error in f32.
    diff = zq - zn
    sse = jnp.sum(diff * diff, axis=-1)                     # (TM,)

    # Lane-dense stores: one (1, 1, TM) row per tile.
    idx_ref[...] = idx.astype(jnp.int32)[None, None, :]
    sse_ref[...] = sse[None, None, :]


@functools.partial(jax.jit, static_argnames=("n_valid", "tile_m"))
def _vq_pallas(z_flat, cb_t, cb_n, *, n_valid, tile_m):
    M, D = z_flat.shape
    n_pad = cb_n.shape[0]
    num_tiles = pl.cdiv(M, tile_m)

    kernel = functools.partial(_vq_kernel, n_valid=n_valid)

    zq, idx, sse = pl.pallas_call(
        kernel,
        out_shape=(
            jax.ShapeDtypeStruct((M, D), z_flat.dtype),
            jax.ShapeDtypeStruct((num_tiles, 1, tile_m), jnp.int32),
            jax.ShapeDtypeStruct((num_tiles, 1, tile_m), jnp.float32),
        ),
        grid_spec=pltpu.PrefetchScalarGridSpec(
            num_scalar_prefetch=0,
            grid=(num_tiles,),
            in_specs=[
                pl.BlockSpec((tile_m, D), lambda i: (i, 0)),
                # Constant block index -> codebook stays VMEM-resident.
                pl.BlockSpec((D, n_pad), lambda i: (0, 0)),
                pl.BlockSpec((n_pad, D), lambda i: (0, 0)),
            ],
            out_specs=[
                pl.BlockSpec((tile_m, D), lambda i: (i, 0)),
                pl.BlockSpec((1, 1, tile_m), lambda i: (i, 0, 0)),
                pl.BlockSpec((1, 1, tile_m), lambda i: (i, 0, 0)),
            ],
        ),
        compiler_params=pltpu.CompilerParams(
            dimension_semantics=("parallel",),
            # <= ~48 MiB keeps headroom on v7x (64 MiB physical); raise toward
            # 64-100 MiB on v5e/v6e if codebook / tile_m is scaled up.
            vmem_limit_bytes=48 * 1024 * 1024,
        ),
    )(z_flat, cb_t, cb_n)

    return zq, idx, sse


def quantize(z, codebook, beta=0.25, tile_m=1024):
    """Canonical VQ quantize: returns (z_q_norm, loss, encoding_indices)."""
    *lead, D = z.shape
    z_flat = z.reshape(-1, D)
    M = z_flat.shape[0]
    n_embed = codebook.shape[0]

    # --- tile selection -----------------------------------------------------
    tile = int(tile_m)
    # VMEM-aware cap: keep each (tile, D) f32 buffer around <= 4 MiB.
    tile = min(tile, max(8, (4 * 1024 * 1024) // (4 * max(D, 1)) // 8 * 8))
    # No bigger than the (8-aligned) row count.
    tile = min(tile, _round_up(M, 8))
    # v7x megacore: ensure at least 2 grid steps when the input allows it.
    if M > 8 and pl.cdiv(M, tile) < 2:
        tile = _round_up(pl.cdiv(M, 2), 8)

    # --- hoisted codebook prep (done once, not per grid step) ---------------
    cb = codebook.astype(jnp.float32)
    cb_n = cb * jax.lax.rsqrt(
        jnp.maximum(jnp.sum(cb * cb, axis=-1, keepdims=True), 1e-24))
    n_pad = _round_up(n_embed, 128)          # MXU output-width alignment
    if n_pad != n_embed:
        cb_n = jnp.pad(cb_n, ((0, n_pad - n_embed), (0, 0)))
    cb_t = jnp.transpose(cb_n).astype(jnp.bfloat16)   # (D, n_pad), bf16 feed

    zq_flat, idx_t, sse_t = _vq_pallas(
        z_flat, cb_t, cb_n, n_valid=n_embed, tile_m=tile)

    sse = sse_t.reshape(-1)[:M]
    idx = idx_t.reshape(-1)[:M]

    mse = jnp.sum(sse) / (M * D)
    # forward value of: beta*mean((sg(zq)-zn)^2) + mean((zq-sg(zn))^2)
    loss = (1.0 + beta) * mse

    z_q = zq_flat.reshape(z.shape)
    indices = idx.reshape(*lead)
    return z_q, loss, indices


def base_quantizer_forward(
    z,
    codebook,
    straight_through=True,
    use_residual=False,
    num_quantizers=None,
    beta=0.25,
    tile_m=1024,
):
    """Mirrors BaseQuantizer.forward()."""
    if not use_residual:
        z_q, loss, encoding_indices = quantize(z, codebook, beta=beta, tile_m=tile_m)
    else:
        z_q = jnp.zeros_like(z)
        residual = jax.lax.stop_gradient(z)
        losses, indices_list = [], []
        for _ in range(num_quantizers):
            z_qi, loss_i, idx_i = quantize(residual, codebook, beta=beta, tile_m=tile_m)
            residual = residual - z_qi
            z_q = z_q + z_qi
            losses.append(loss_i)
            indices_list.append(idx_i)
        losses = jnp.stack(losses, axis=-1)
        encoding_indices = jnp.stack(indices_list, axis=-1)
        loss = jnp.mean(losses)
    if straight_through:
        z_q = z + jax.lax.stop_gradient(z_q - z)
    return z_q, loss, encoding_indices


if __name__ == "__main__":
    # Module config (small, consistent with __init__ signature)
    embed_dim = 32
    n_embed = 64

    key = jax.random.PRNGKey(0)
    k_emb, k_z = jax.random.split(key)

    # nn.Embedding(n_embed, embed_dim).weight.data.normal_()
    codebook = jax.random.normal(k_emb, (n_embed, embed_dim), dtype=jnp.float32)

    # input: (B, N, embed_dim) -- channels-last, normalized over last axis
    B, N = 2, 16
    z = jax.random.normal(k_z, (B, N, embed_dim), dtype=jnp.float32)

    z_q, loss, indices = base_quantizer_forward(
        z, codebook, straight_through=True, use_residual=False
    )
    jax.block_until_ready((z_q, loss, indices))

    assert z_q.shape == z.shape
    assert indices.shape == (B, N)
    assert loss.shape == ()
    assert bool(jnp.isfinite(loss))
    assert bool(jnp.all(indices >= 0)) and bool(jnp.all(indices < n_embed))
    print("KERNEL_OK")
</pallas_src>

<mosaic_0001>
module attributes {stable_mosaic.version = 11 : i64} {
  func.func @_vq_kernel(%arg0: i32, %arg1: memref<16x32xf32, #tpu.memory_space<vmem>>, %arg2: memref<32x128xbf16, #tpu.memory_space<vmem>>, %arg3: memref<128x32xf32, #tpu.memory_space<vmem>>, %arg4: memref<16x32xf32, #tpu.memory_space<vmem>>, %arg5: memref<1x1x16xi32, #tpu.memory_space<vmem>>, %arg6: memref<1x1x16xf32, #tpu.memory_space<vmem>>) attributes {dimension_semantics = [#tpu.dimension_semantics<parallel>], iteration_bounds = array<i64: 2>, scalar_prefetch = 0 : i64, scratch_operands = 0 : i64, tpu.core_type = #tpu.core_type<tc>, window_params = [{transform_indices = @transform_0, window_bounds = array<i64: 16, 32>}, {pipeline_mode = #tpu.pipeline_mode<synchronous>, transform_indices = @transform_1, window_bounds = array<i64: 32, 128>}, {pipeline_mode = #tpu.pipeline_mode<synchronous>, transform_indices = @transform_2, window_bounds = array<i64: 128, 32>}, {transform_indices = @transform_3, window_bounds = array<i64: 16, 32>}, {transform_indices = @transform_4, window_bounds = array<i64: 1, 1, 16>}, {transform_indices = @transform_5, window_bounds = array<i64: 1, 1, 16>}]} {
    %c0 = arith.constant 0 : index
    %c0_0 = arith.constant 0 : index
    %0 = vector.load %arg1[%c0, %c0_0] : memref<16x32xf32, #tpu.memory_space<vmem>>, vector<16x32xf32>
    %1 = arith.mulf %0, %0 : vector<16x32xf32>
    %cst = arith.constant dense<0.000000e+00> : vector<16xf32>
    %2 = vector.multi_reduction <add>, %1, %cst [1] : vector<16x32xf32> to vector<16xf32>
    %3 = vector.shape_cast %2 : vector<16xf32> to vector<16x1xf32>
    %cst_1 = arith.constant 1.000000e-24 : f32
    %4 = vector.broadcast %cst_1 : f32 to vector<16x1xf32>
    %5 = arith.maximumf %3, %4 : vector<16x1xf32>
    %6 = math.rsqrt %5 : vector<16x1xf32>
    %7 = vector.broadcast %6 : vector<16x1xf32> to vector<16x32xf32>
    %8 = arith.mulf %0, %7 : vector<16x32xf32>
    %9 = arith.truncf %8 : vector<16x32xf32> to vector<16x32xbf16>
    %c0_2 = arith.constant 0 : index
    %c0_3 = arith.constant 0 : index
    %10 = vector.load %arg2[%c0_2, %c0_3] : memref<32x128xbf16, #tpu.memory_space<vmem>>, vector<32x128xbf16>
    %cst_4 = arith.constant dense<0.000000e+00> : vector<16x128xf32>
    %11 = tpu.matmul %9, %10, %cst_4 {dimension_numbers = #tpu.dot_dimension_numbers<[1], [0], [0], [1], [0, 0, 1, 1], [], []>} : vector<16x32xbf16>, vector<32x128xbf16>, vector<16x128xf32> -> vector<16x128xf32>
    %12 = tpu.iota {dimensions = array<i32: 1>} : vector<16x128xi32>
    %c64_i32 = arith.constant 64 : i32
    %13 = vector.broadcast %c64_i32 : i32 to vector<16x128xi32>
    %14 = arith.cmpi slt, %12, %13 : vector<16x128xi32>
    %cst_5 = arith.constant 0xFF800000 : f32
    %15 = vector.broadcast %cst_5 : f32 to vector<16x128xf32>
    %16 = arith.select %14, %11, %15 : vector<16x128xi1>, vector<16x128xf32>
    %17 = tpu.reduce_index %16 {axis = 1 : i32, kind = #tpu.reduction_kind<arg_max>} : vector<16x128xf32> -> vector<16xi32>
    %18 = vector.shape_cast %17 : vector<16xi32> to vector<16x1xi32>
    %19 = vector.broadcast %18 : vector<16x1xi32> to vector<16x128xi32>
    %20 = arith.cmpi eq, %12, %19 : vector<16x128xi32>
    %21 = arith.extui %20 : vector<16x128xi1> to vector<16x128xi32>
    %22 = arith.sitofp %21 : vector<16x128xi32> to vector<16x128xf32>
    %c0_6 = arith.constant 0 : index
    %c0_7 = arith.constant 0 : index
    %23 = vector.load %arg3[%c0_6, %c0_7] : memref<128x32xf32, #tpu.memory_space<vmem>>, vector<128x32xf32>
    %cst_8 = arith.constant dense<0.000000e+00> : vector<16x32xf32>
    %24 = tpu.matmul %22, %23, %cst_8 {dimension_numbers = #tpu.dot_dimension_numbers<[1], [0], [0], [1], [0, 0, 1, 1], [], []>} : vector<16x128xf32>, vector<128x32xf32>, vector<16x32xf32> -> vector<16x32xf32>
    %c0_9 = arith.constant 0 : index
    %c0_10 = arith.constant 0 : index
    %25 = vector.load %arg4[%c0_9, %c0_10] : memref<16x32xf32, #tpu.memory_space<vmem>>, vector<16x32xf32>
    tpu.vector_store %arg4[%c0_9, %c0_10], %24 {strides = array<i32>} : memref<16x32xf32, #tpu.memory_space<vmem>>, vector<16x32xf32>,
    %26 = arith.subf %24, %8 : vector<16x32xf32>
    %27 = arith.mulf %26, %26 : vector<16x32xf32>
    %cst_11 = arith.constant dense<0.000000e+00> : vector<16xf32>
    %28 = vector.multi_reduction <add>, %27, %cst_11 [1] : vector<16x32xf32> to vector<16xf32>
    %29 = vector.shape_cast %17 : vector<16xi32> to vector<1x1x16xi32>
    %c0_12 = arith.constant 0 : index
    %c0_13 = arith.constant 0 : index
    %c0_14 = arith.constant 0 : index
    %30 = vector.load %arg5[%c0_12, %c0_13, %c0_14] : memref<1x1x16xi32, #tpu.memory_space<vmem>>, vector<1x1x16xi32>
    tpu.vector_store %arg5[%c0_12, %c0_13, %c0_14], %29 {strides = array<i32>} : memref<1x1x16xi32, #tpu.memory_space<vmem>>, vector<1x1x16xi32>,
    %31 = vector.shape_cast %28 : vector<16xf32> to vector<1x1x16xf32>
    %c0_15 = arith.constant 0 : index
    %c0_16 = arith.constant 0 : index
    %c0_17 = arith.constant 0 : index
    %32 = vector.load %arg6[%c0_15, %c0_16, %c0_17] : memref<1x1x16xf32, #tpu.memory_space<vmem>>, vector<1x1x16xf32>
    tpu.vector_store %arg6[%c0_15, %c0_16, %c0_17], %31 {strides = array<i32>} : memref<1x1x16xf32, #tpu.memory_space<vmem>>, vector<1x1x16xf32>,
    return
  }
  func.func @transform_0(%arg0: i32) -> (i32, i32) {
    %c0_i32 = arith.constant 0 : i32
    %c0_i32_0 = arith.constant 0 : i32
    return %arg0, %c0_i32 : i32, i32
  }
  func.func @transform_1(%arg0: i32) -> (i32, i32) {
    %c0_i32 = arith.constant 0 : i32
    %c0_i32_0 = arith.constant 0 : i32
    %c0_i32_1 = arith.constant 0 : i32
    return %c0_i32, %c0_i32_0 : i32, i32
  }
  func.func @transform_2(%arg0: i32) -> (i32, i32) {
    %c0_i32 = arith.constant 0 : i32
    %c0_i32_0 = arith.constant 0 : i32
    %c0_i32_1 = arith.constant 0 : i32
    return %c0_i32, %c0_i32_0 : i32, i32
  }
  func.func @transform_3(%arg0: i32) -> (i32, i32) {
    %c0_i32 = arith.constant 0 : i32
    %c0_i32_0 = arith.constant 0 : i32
    return %arg0, %c0_i32 : i32, i32
  }
  func.func @transform_4(%arg0: i32) -> (i32, i32, i32) {
    %c0_i32 = arith.constant 0 : i32
    %c0_i32_0 = arith.constant 0 : i32
    %c0_i32_1 = arith.constant 0 : i32
    return %arg0, %c0_i32, %c0_i32_0 : i32, i32, i32
  }
  func.func @transform_5(%arg0: i32) -> (i32, i32, i32) {
    %c0_i32 = arith.constant 0 : i32
    %c0_i32_0 = arith.constant 0 : i32
    %c0_i32_1 = arith.constant 0 : i32
    return %arg0, %c0_i32, %c0_i32_0 : i32, i32, i32
  }
}

</mosaic_0001>

<bundles_post_ra>
// kernel: _vq_pallas.1
= control target key start
LH: loop header
LB: loop body
LE: loop exit
PB: predicated region body
PF: predicated region fallthrough
CT: control target
= control target key end

     0   :  { %s1029_s0 = inlined_call_operand.vmem [shape: f32[32,32], index: 0, kind: input, shape index: {}]   ;;  %s1030_s1 = inlined_call_operand.vmem [shape: bf16[32,128], index: 1, kind: input, shape index: {}]   ;;  %s1031_s2 = inlined_call_operand.vmem [shape: f32[128,32], index: 2, kind: input, shape index: {}]   ;;  %s1032_s3 = inlined_call_operand.hbm [shape: f32[32,32], index: 3, kind: output, shape index: {0}]   ;;  %s1033_s4 = inlined_call_operand.hbm [shape: s32[2,1,16], index: 4, kind: output, shape index: {1}]   ;;  %s1034_s5 = inlined_call_operand.hbm [shape: f32[2,1,16], index: 5, kind: output, shape index: {2}]  }
   0x1   :  { %1036 = sst [smem:[#allocation9_spill]] %s1029_s0 }
   0x2   :  { %11 = vsyncpa [#allocation3], 0 }
   0x3   :  { %13 = vsyncpa [#allocation3 + $0x1], 0 }
   0x4   :  { %14 = vsyncpa [#allocation5], 0 }
   0x5   :  { %16 = vsyncpa [#allocation5 + $0x1], 0  ;;  %s814_s18 = smov 0   ;;  %s816_s19 = smov 0  }
   0x6   :  { %s818_s20 = smov 0   ;;  %s820_s21 = smov 0  }
   0x7 LB: > { %s835_s22 = sadd.s32 4294967295, %s779_s21   ;;  %s1035_s23 = sadd.s32 4294967294, %s779_s21   ;;  %s779_s21 = sphi %s820_s21, %s1044_s21   ;;  %s775_s20 = sphi %s818_s20, %s1043_s20   ;;  %s771_s19 = sphi %s816_s19, %s1042_s19   ;;  %s767_s18 = sphi %s814_s18, %s1041_s18  }
   0x8   : > { %s839_s24 = sadd.s32 1, %s779_s21   ;;  %s97_s25 = sadd.s32 1, %s775_s20 }
   0x9   : > { %s94_s26 = ssub.s32 %s779_s21, %s839_s24  ;;  %p107_p0 = scmp.ne.s32.totalorder %s775_s20, %s771_s19 }
   0xa   : > { %p95_p1 = scmp.eq.s32.totalorder %s94_s26, 0  ;;  %p108_p2 = scmp.eq.s32.totalorder %s835_s22, 1 }
   0xb   : > { %p113_p3 = scmp.ne.s32.totalorder %s771_s19, %s767_s18  ;;  %p114_p4 = scmp.eq.s32.totalorder %s1035_s23, 1 }
   0xc   : > { %s852_s27 = scalar_select %p95_p1, %s775_s20, %s97_s25  }
   0xd   : > { %p854_p5 = por %p108_p2, %p107_p0  ;;  %p858_p6 = por %p114_p4, %p113_p3 }
   0xe   : > { %p560_p7 = scmp.ge.s32.totalorder %s779_s21, 1  ;;  %p199_p8 = scmp.lt.s32.totalorder %s779_s21, 3 }
  0x10   : > { %p200_p9 = pnand %p560_p7, %p199_p8 }
  0x11   : > { %s562_s30 = sshll.u32 (!%p200_p9), %s835_s22, 1  ;;  %s1039_s0 = sld [smem:[#allocation9_spill]] (!%p200_p9) }
  0x12   : > { %203 = sbr.rel (%p200_p9) target bundleno = 711 (0x2c7), region = 32  ;;  %p236_p10 = scmp.lt.s32.totalorder (!%p200_p9), %s562_s30, 3 }
  0x13   : > { %s939_s16 = sand.u32 (!%p200_p9), 1, %s771_s19   ;;  %s427_s8 = scalar_lea.hbm (!%p200_p9), %s1033_s4, %s835_s22 }
  0x14   : > { %s228_s17 = scalar_lea.vmem (!%p200_p9), [#allocation4], %s939_s16  ;;  %s561_s25 = sshll.u32 (!%p200_p9), %s939_s16, 4 }
  0x15   : > { %s222_s26 = scalar_lea.vmem (!%p200_p9), [#allocation2], %s561_s25  ;;  %s397_s10 = sand.u32 (!%p200_p9), 1, %s835_s22  }
  0x16   : > { %s429_s11 = sshll.u32 (!%p200_p9), %s228_s17, 4  ;;  %s431_s12 = sshll.u32 (!%p200_p9), %s427_s8, 4  ;;  %s430_s11 = int_to_ptr.vmem [resolvable:$true] %s429_s11  ;;  %s432_s12 = int_to_ptr.hbm [resolvable:$true] %s431_s12 }
  0x17   : > { %s1046_s30 = smov (!%p236_p10, %s562_s30), 3  ;;  %vm247_vm0 = vcmask 261120   ;;  %v583_v6 = vld [vmem:[%s1030_s1 + $0x8] sm:$0xff]  ;;  %v582_v7 = vld [vmem:[%s1030_s1] sm:$0xff]  ;;  %v342_v29 = vld [vmem:[%s1031_s2 + $0x78] sm:$0xff]  ;;  %v312_v38 = vlaneseq  ;;  %v781_v52 = vmov 1.0  }
  0x18   : > { %s563_s6 = sshll.u32 %s1046_s30, 3  ;;  %304 = vmatpush.bf16.msra.mxu0 %v583_v6  ;;  %v341_v30 = vld [vmem:[%s1031_s2 + $0x70] sm:$0xff]  ;;  %585 = vmatpush.msra.mxu2 %v342_v29  ;;  %v340_v31 = vld [vmem:[%s1031_s2 + $0x68] sm:$0xff]  ;;  %v339_v32 = vld [vmem:[%s1031_s2 + $0x60] sm:$0xff]  ;;  %vm381_vm9 = vcmask 130112   ;;  %vm383_vm11 = vcmask 122880  }
  0x19   : > { %s239_s9 = scalar_lea.vmem %s1039_s0, %s563_s6  ;;  %343 = vmatpush.msra.mxu1 %v342_v29  ;;  %v338_v33 = vld [vmem:[%s1031_s2 + $0x58] sm:$0xff]  ;;  %v337_v34 = vld [vmem:[%s1031_s2 + $0x50] sm:$0xff]  ;;  %v336_v35 = vld [vmem:[%s1031_s2 + $0x48] sm:$0xff]  ;;  %v913_v41 = vand.u32 127, %v312_v38  ;;  %s413_s30 = sshll.u32 %s222_s26, 4  ;;  %s949_s30 = int_to_ptr.vmem [resolvable:$true] %s413_s30 }
  0x1a   : > { %v243_v0 = vld [vmem:[%s239_s9] sm:$0xff]  ;;  %v244_v2 = vld [vmem:[%s239_s9 + $0x8] sm:$0xff]  ;;  %586 = vmatpush.msra.mxu2 %v341_v30  ;;  %v334_v39 = vld [vmem:[%s1031_s2 + $0x38] sm:$0xff]  ;;  %s584_s9 = sshll.u32 %s835_s22, 4  ;;  %s964_s25 = scalar_lea.sflag [#allocation5], %s397_s10 }
  0x1b   : > { %v245_v1 = vmul.f32 %v243_v0, %v243_v0  ;;  %v246_v4 = vmul.f32 %v244_v2, %v244_v2  ;;  %344 = vmatpush.msra.mxu1 %v341_v30  ;;  %v335_v36 = vld [vmem:[%s1031_s2 + $0x40] sm:$0xff]  ;;  %v333_v40 = vld [vmem:[%s1031_s2 + $0x30] sm:$0xff]  ;;  %v332_v42 = vld [vmem:[%s1031_s2 + $0x28] sm:$0xff]  ;;  %vm314_vm7 = vcmp.lt.s32.totalorder %v913_v41, 64  ;;  %v936_v53 = vadd.s32 4294967288, %v913_v41  ;;  %s412_s15 = scalar_lea.hbm %s1032_s3, %s584_s9  ;;  %s677_s23 = scalar_lea.hbm %s1033_s4, 2 }
  0x1c   : > { %305 = vmatpush.bf16.msra.mxu0 %v582_v7  ;;  %587 = vmatpush.msra.mxu2 %v340_v31  ;;  %v331_v43 = vld [vmem:[%s1031_s2 + $0x20] sm:$0xff]  ;;  %v330_v45 = vld [vmem:[%s1031_s2 + $0x18] sm:$0xff]  ;;  %v329_v47 = vld [vmem:[%s1031_s2 + $0x10] sm:$0xff] }
  0x1d   : > { %v248_v3 = vsel %vm247_vm0, %v245_v1, 0.0  ;;  %v251_v5 = vsel %vm247_vm0, %v246_v4, 0.0  ;;  %345 = vmatpush.msra.mxu1 %v340_v31  ;;  %v328_v48 = vld [vmem:[%s1031_s2 + $0x8] sm:$0xff]  ;;  %v327_v50 = vld [vmem:[%s1031_s2] sm:$0xff] }
  0x1e   : > { %249 = vadd.xlane.f32.xlu0 %v248_v3  ;;  %588 = vmatpush.msra.mxu2 %v339_v32 }
  0x1f   : > { %346 = vmatpush.msra.mxu1 %v339_v32 }
  0x20   : > { %589 = vmatpush.msra.mxu2 %v338_v33 }
  0x21   : > { %347 = vmatpush.msra.mxu1 %v338_v33 }
  0x22   : > { %590 = vmatpush.msra.mxu2 %v337_v34 }
  0x23   : > { %348 = vmatpush.msra.mxu1 %v337_v34 }
  0x24   : > { %591 = vmatpush.msra.mxu2 %v336_v35 }
  0x25   : > { %349 = vmatpush.msra.mxu1 %v336_v35 }
  0x26   : > { %252 = vadd.xlane.f32.xlu0 %v251_v5  ;;  %592 = vmatpush.msra.mxu2 %v335_v36 }
  0x27   : > { %350 = vmatpush.msra.mxu1 %v335_v36 }
  0x28   : > { %593 = vmatpush.msra.mxu2 %v334_v39 }
  0x29   : > { %351 = vmatpush.msra.mxu1 %v334_v39 }
  0x2a   : > { %594 = vmatpush.msra.mxu2 %v333_v40 }
  0x2b   : > { %352 = vmatpush.msra.mxu1 %v333_v40 }
  0x2c   : > { %595 = vmatpush.msra.mxu2 %v332_v42 }
  0x2d   : > { %353 = vmatpush.msra.mxu1 %v332_v42 }
  0x2e   : > { %596 = vmatpush.msra.mxu2 %v331_v43 }
  0x2f   : > { %354 = vmatpush.msra.mxu1 %v331_v43 }
  0x30   : > { %597 = vmatpush.msra.mxu2 %v330_v45 }
  0x31   : > { %355 = vmatpush.msra.mxu1 %v330_v45 }
  0x32   : > { %598 = vmatpush.msra.mxu2 %v329_v47 }
  0x33   : > { %356 = vmatpush.msra.mxu1 %v329_v47 }
  0x34   : > { %599 = vmatpush.msra.mxu2 %v328_v48 }
  0x35   : > { %357 = vmatpush.msra.mxu1 %v328_v48 }
  0x36   : > { %600 = vmatpush.msra.mxu2 %v327_v50 }
  0x37   : > { %358 = vmatpush.msra.mxu1 %v327_v50 }
  0x91   : > { %v250_v8 = vpop.xlane.xlu0 %249 }
  0x92   : > { %v254_v9 = vmax.f32 %v250_v8, 1e-24 }
  0x94   : > { %653 = vrsqrt.f32 %v254_v9  ;;  %vm262_vm2 = vweird.f32 %v254_v9 }
  0x99   : > { %v253_v10 = vpop.xlane.xlu0 %252 }
  0x9a   : > { %v654_v11 = vpop.eup %653  ;;  %v255_v12 = vmax.f32 %v253_v10, 1e-24 }
  0x9b   : > { %v257_v13 = vmul.f32 %v654_v11, %v254_v9  ;;  %vm263_vm1 = vweird.f32 %v654_v11 }
  0x9c   : > { %655 = vrsqrt.f32 %v255_v12  ;;  %vm264_vm4 = vmor %vm262_vm2, %vm263_vm1  ;;  %vm272_vm5 = vweird.f32 %v255_v12 }
  0x9d   : > { %v258_v14 = vmul.f32 %v654_v11, %v257_v13 }
  0x9f   : > { %v259_v15 = vmul.f32 0.5, %v258_v14 }
  0xa1   : > { %v260_v17 = vsub.f32 1.5, %v259_v15 }
  0xa2   : > { %v656_v16 = vpop.eup %655 }
  0xa3   : > { %v267_v18 = vmul.f32 %v656_v16, %v255_v12  ;;  %v261_v20 = vmul.f32 %v654_v11, %v260_v17  ;;  %vm273_vm3 = vweird.f32 %v656_v16 }
  0xa4   : > { %vm274_vm6 = vmor %vm272_vm5, %vm273_vm3 }
  0xa5   : > { %v268_v19 = vmul.f32 %v656_v16, %v267_v18  ;;  %v265_v24 = vsel %vm264_vm4, %v654_v11, %v261_v20 }
  0xa6   : > { %v876_v26 = vmul.f32 %v265_v24, %v243_v0 }
  0xa7   : > { %v269_v21 = vmul.f32 0.5, %v268_v19 }
  0xa9   : > { %v270_v22 = vsub.f32 1.5, %v269_v21 }
  0xab   : > { %v271_v23 = vmul.f32 %v656_v16, %v270_v22 }
  0xad   : > { %v275_v25 = vsel %vm274_vm6, %v656_v16, %v271_v23 }
  0xae   : > { %v878_v27 = vmul.f32 %v275_v25, %v244_v2 }
  0xb0   : > { %v278_v28 = vpack.c.bf16 %v878_v27, %v876_v26 }
  0xb2   : > { %572 = vmatmul.msk.bf16.vlgmr.msra.gmra.mxu0 %vm247_vm0, %v278_v28 }
 0x12f   : > { %v307_v37 = vpop.f32.mrf.mxu0 }
 0x130   : > { %v315_v49 = vsel %vm314_vm7, %v307_v37, -inf }
 0x137   : > { %v309_v44 = vpop.f32.mrf.mxu0 }
 0x138   : > { %v316_v46 = vsel %vm314_vm7, %v309_v44, -inf }
 0x139   : > { %319 = vmax.index.xlane.f32.xlu1 %v316_v46 }
 0x141   : > { %317 = vmax.index.xlane.f32.xlu1 %v315_v49 }
 0x1ac   : > { %v320_v51 = vpop.xlane.xlu1 %319 }
 0x1ad   : > { %vm322_vm8 = vcmp.eq.s32.totalorder %v913_v41, %v320_v51  ;;  %v380_v55 = vperm.slane %v320_v51, %v936_v53 }
 0x1ae   : > { %576 = vmatmul.msk.f32.vlgmr.msra.gmra.mxu2 %vm322_vm8, %v781_v52 }
 0x1b4   : > { %v318_v54 = vpop.xlane.xlu1 %317 }
 0x1b5   : > { %vm321_vm10 = vcmp.eq.s32.totalorder %v913_v41, %v318_v54  ;;  %v378_v56 = vperm.slane %v318_v54, %v913_v41 }
 0x1b6   : > { %575 = vmatmul.msk.f32.vlgmr.msra.gmra.mxu1 %vm321_vm10, %v781_v52 }
 0x1b7   : > { %v382_v57 = vsel %vm381_vm9, %v380_v55, %v378_v56 }
 0x1b8   : > { %384 = vst.msk [vmem:[%s228_s17] sm:$0x1] %vm383_vm11, %v382_v57 }
 0x231   : > { %v363_v58 = vpop.f32.mrf.mxu2 }
 0x232   : > { %367 = vst.msk [vmem:[%s222_s26 + $0x8] sm:$0xff] %vm247_vm0, %v363_v58  ;;  %v369_v62 = vsub.f32 %v363_v58, %v878_v27 }
 0x233   : > { %v360_v59 = vpop.f32.mrf.mxu1 }
 0x234   : > { %366 = vst.msk [vmem:[%s222_s26] sm:$0xff] %vm247_vm0, %v360_v59  ;;  %v368_v60 = vsub.f32 %v360_v59, %v876_v26  ;;  %s671_s26 = sshra.s32 %s432_s12, 4  ;;  %s672_s26 = int_to_ptr.hbm [resolvable:$true] %s671_s26 }
 0x235   : > { %s673_s6 = scalar_lea.hbm %s672_s26, 1  ;;  %p678_p0 = scmp.lt.s32.totalorder %s672_s26, %s1033_s4 }
 0x236   : > { %v370_v61 = vmul.f32 %v368_v60, %v368_v60  ;;  %p674_p11 = scmp.ne.s32.totalorder %s672_s26, %s673_s6  ;;  %p679_p1 = scmp.lt.s32.totalorder %s677_s23, %s673_s6 }
 0x238   : > { %v372_v63 = vsel %vm247_vm0, %v370_v61, 0.0  ;;  %p675_p12 = pnand %p674_p11, %p854_p5  ;;  %p680_p2 = por %p679_p1, %p678_p0 }
 0x239   : > { %373 = vadd.xlane.f32.xlu2 %v372_v63 }
 0x23a   : > { %p676_p13 = pneg %p675_p12 }
 0x23c   : > { %p681_p3 = pnand %p680_p2, %p676_p13 }
 0x23e   : > { %684 = shalt.err (!%p681_p3)
}
 0x23f   : > { %602 = dma.vmem_to_hbm [thread:$0]  (%p854_p5), %s430_s11, 16, %s432_s12, %s964_s25   ;;  %v371_v0 = vmul.f32 %v369_v62, %v369_v62 }
 0x240   : > { %s415_s9 = sshll.u32 %s412_s15, 4  ;;  %s393_s10 = scalar_lea.sflag [#allocation3], %s939_s16  ;;  %s416_s9 = int_to_ptr.hbm [resolvable:$true] %s415_s9 }
 0x241   : > { %s699_s13 = sshra.s32 %s416_s9, 4  ;;  %s705_s26 = scalar_lea.hbm %s1032_s3, 32  ;;  %s700_s13 = int_to_ptr.hbm [resolvable:$true] %s699_s13 }
 0x242   : > { %s701_s14 = scalar_lea.hbm %s700_s13, 16  ;;  %p706_p9 = scmp.lt.s32.totalorder %s700_s13, %s1032_s3 }
 0x243   : > { %p702_p4 = scmp.ne.s32.totalorder %s700_s13, %s701_s14  ;;  %p707_p10 = scmp.lt.s32.totalorder %s705_s26, %s701_s14 }
 0x245   : > { %p703_p7 = pnand %p702_p4, %p854_p5  ;;  %p708_p11 = por %p707_p10, %p706_p9 }
 0x247   : > { %p704_p8 = pneg %p703_p7 }
 0x249   : > { %p709_p12 = pnand %p708_p11, %p704_p8 }
 0x24b   : > { %712 = shalt.err (!%p709_p12)
}
 0x24c   : > { %s782_s11 = smov 128   ;;  %s783_s12 = smov 8   ;;  %v375_v1 = vsel %vm247_vm0, %v371_v0, 0.0 }
 0x24d   : > { %601 = dma.vmem_to_hbm [thread:$0]  (%p854_p5), %s949_s30, 256, %s416_s9, %s393_s10, %s782_s11, %s782_s11, %s783_s12   ;;  %376 = vadd.xlane.f32.xlu2 %v375_v1 }
 0x24e   : > { %s440_s8 = scalar_lea.hbm %s1034_s5, %s835_s22  ;;  %s234_s13 = scalar_lea.vmem [#allocation6], %s939_s16 }
 0x24f   : > { %s442_s14 = sshll.u32 %s234_s13, 4  ;;  %s444_s0 = sshll.u32 %s440_s8, 4  ;;  %s443_s14 = int_to_ptr.vmem [resolvable:$true] %s442_s14  ;;  %s445_s0 = int_to_ptr.hbm [resolvable:$true] %s444_s0 }
 0x250   : > { %s727_s30 = sshra.s32 %s445_s0, 4  ;;  %s733_s10 = scalar_lea.hbm %s1034_s5, 2  ;;  %s728_s30 = int_to_ptr.hbm [resolvable:$true] %s727_s30 }
 0x251   : > { %s729_s9 = scalar_lea.hbm %s728_s30, 1  ;;  %p734_p2 = scmp.lt.s32.totalorder %s728_s30, %s1034_s5 }
 0x252   : > { %p730_p13 = scmp.ne.s32.totalorder %s728_s30, %s729_s9  ;;  %p735_p3 = scmp.lt.s32.totalorder %s733_s10, %s729_s9 }
 0x254   : > { %p731_p0 = pnand %p730_p13, %p854_p5  ;;  %p736_p4 = por %p735_p3, %p734_p2 }
 0x256   : > { %p732_p1 = pneg %p731_p0 }
 0x258   : > { %p737_p7 = pnand %p736_p4, %p732_p1 }
 0x2ac   : > { %v374_v2 = vpop.xlane.xlu2 %373 }
 0x2ad   : > { %v387_v4 = vperm.slane %v374_v2, %v913_v41 }
 0x2c0   : > { %v377_v3 = vpop.xlane.xlu2 %376 }
 0x2c1   : > { %v388_v5 = vperm.slane %v377_v3, %v936_v53 }
 0x2c3   : > { %v389_v6 = vsel %vm381_vm9, %v388_v5, %v387_v4 }
 0x2c4   : > { %391 = vst.msk [vmem:[%s234_s13] sm:$0x1] %vm383_vm11, %v389_v6 }
 0x2c5   : > { %740 = shalt.err (!%p737_p7)
}
 0x2c6   : > { %603 = dma.vmem_to_hbm [thread:$0]  (%p854_p5), %s443_s14, 16, %s445_s0, %s964_s25  }
 0x2c7 PF: > { %p617_p8 = scmp.ge.s32.totalorder %s779_s21, 2  ;;  %s456_s6 = sand.u32 1, %s767_s18  }
 0x2c8   : > { %s457_s17 = scalar_lea.sflag [#allocation3], %s456_s6 }
 0x2c9   : > { %p608_p9 = pnand %p617_p8, %p858_p6 }
 0x2cb   : > { %p609_p10 = pneg %p608_p9 }
 0x2cd   : > { %758 = dma.done.wait (%p609_p10), %s457_s17, 256  }
 0x2ce   : > { %760 = vsyncadd (%p609_p10), %s457_s17, 4294967040  ;;  %s1040_s11 = sadd.s32 4294967294, %s779_s21  }
 0x2cf   : > { %s466_s12 = sand.u32 1, %s1040_s11  }
 0x2d0   : > { %s467_s15 = scalar_lea.sflag [#allocation5], %s466_s12 }
 0x2d1   : > { %762 = dma.done.wait (%p609_p10), %s467_s15, 32  }
 0x2d2   : > { %764 = vsyncadd (%p609_p10), %s467_s15, 4294967264  ;;  %p19_p5 = scmp.ge.s32.totalorder %s839_s24, 4   ;;  %s1041_s18 = smov %s771_s19 }
 0x2d3   : > { %s1042_s19 = smov %s775_s20  ;;  %s1043_s20 = smov %s852_s27 }
 0x2d4   : > { %s1044_s21 = smov %s839_s24  ;;  %21 = sbr.rel (!%p19_p5) target bundleno = 7 (0x7), region = 99 }
 0x2d9   :  { %481 = vsyncpa [#allocation3], 1 }
 0x2da   :  { %483 = vsyncpa [#allocation3 + $0x1], 1 }
 0x2db   :  { %484 = vsyncpa [#allocation5], 1 }
 0x2dc   :  { %486 = vsyncpa [#allocation5 + $0x1], 1 }

</bundles_post_ra>
